<compile_context>
chip_gen: v5e
topology: v5e:2x2
jax: 0.10.0
libtpu: 0.0.40
codegen_flags: <defaults>
</compile_context>

<pallas_src>
import functools

import jax
import jax.numpy as jnp
import numpy as np
from jax import lax
from jax.experimental import pallas as pl
from jax.experimental.pallas import tpu as pltpu


# ------------------------------ Pallas kernel --------------------------------

def _block_resnext_kernel(x_ref, w1sc_ref, t1sc_ref, w2_ref, t2_ref, w3_ref,
                          t3_ref, mask_ref, o_ref, *, W, Cg):
    Ms = x_ref.shape[-1]          # images_per_step * H * W  (lane axis)
    cdt = w1sc_ref.dtype          # matmul operand dtype (f32, or bf16 on v6e/v7x)

    xT = x_ref[0].astype(cdt)                                 # (Cin, Ms)

    # conv1 (1x1) and shortcut conv (1x1) fused into ONE matmul; BN scales are
    # pre-folded into the weight rows, so the epilogue is just a shift (+ReLU).
    y01 = jnp.dot(w1sc_ref[...], xT, preferred_element_type=jnp.float32)
    y01 = y01 + t1sc_ref[...]                                 # (Cg+Cout, Ms)
    out1 = jnp.maximum(y01[:Cg, :], 0.0)                      # BN1 + ReLU
    sc = y01[Cg:, :]                                          # shortcut BN (no ReLU)

    # Grouped 3x3 conv as ONE K = 9*Cg matmul. Taps are built in-register by
    # rolling the flattened pixel (lane) axis; precomputed border masks zero the
    # positions that correspond to the per-image zero padding / image boundaries.
    taps = []
    k = 0
    for dy in range(3):
        for dx in range(3):
            off = (dy - 1) * W + (dx - 1)
            tap = out1 if off == 0 else pltpu.roll(out1, shift=(-off) % Ms, axis=1)
            taps.append((tap * mask_ref[k]).astype(cdt))      # (Cg, Ms)
            k += 1
    slab = jnp.concatenate(taps, axis=0)                      # (9*Cg, Ms), sublane-aligned
    out2 = jnp.dot(w2_ref[...], slab, preferred_element_type=jnp.float32)
    out2 = jnp.maximum(out2 + t2_ref[...], 0.0)               # BN2 + ReLU

    # conv3 (1x1) + BN3 + shortcut add + ReLU.
    y3 = jnp.dot(w3_ref[...], out2.astype(cdt), preferred_element_type=jnp.float32)
    o_ref[0] = jnp.maximum(y3 + t3_ref[...] + sc, 0.0).astype(o_ref.dtype)


# -------------------------------- wrapper -------------------------------------

def _pick_images_per_step(n, hw, lane_cap=1024):
    """Largest divisor of n with ips*hw <= lane_cap (keeps the lane axis dense)."""
    ips = 1
    for d in range(1, n + 1):
        if n % d == 0 and d * hw <= lane_cap:
            ips = d
    return ips


def _border_masks(ips, H, W):
    """(9, 1, ips*H*W) float masks: 1 where the 3x3 tap hits a valid pixel."""
    HW = H * W
    m = np.arange(ips * HW)
    y = (m % HW) // W
    x = m % W
    masks = np.zeros((9, 1, ips * HW), np.float32)
    k = 0
    for dy in range(3):
        for dx in range(3):
            valid = ((y + dy - 1 >= 0) & (y + dy - 1 < H) &
                     (x + dx - 1 >= 0) & (x + dx - 1 < W))
            masks[k, 0, :] = valid.astype(np.float32)
            k += 1
    return jnp.asarray(masks)


def block_resnext_forward(x_nchw, p):
    """Forward pass of Block_ResNext (stride=1, conv shortcut) as ONE Pallas kernel."""
    N, Cin, H, W = x_nchw.shape
    HW = H * W
    Cg = p["t2"].shape[0]
    Cout = p["t3"].shape[0]

    ips = _pick_images_per_step(N, HW)      # images handled per grid step
    G = N // ips
    Ms = ips * HW                           # lane-axis width per step

    # (N, Cin, H, W) -> (G, Cin, ips*HW): pixels of `ips` images on the lane axis.
    xg = x_nchw.reshape(G, ips, Cin, HW).transpose(0, 2, 1, 3).reshape(G, Cin, Ms)
    masks = _border_masks(ips, H, W)

    kernel = functools.partial(_block_resnext_kernel, W=W, Cg=Cg)
    out = pl.pallas_call(
        kernel,
        out_shape=jax.ShapeDtypeStruct((G, Cout, Ms), jnp.float32),
        grid=(G,),
        in_specs=[
            pl.BlockSpec((1, Cin, Ms), lambda g: (g, 0, 0)),
            pl.BlockSpec(p["w1sc"].shape, lambda g: (0, 0)),
            pl.BlockSpec(p["t1sc"].shape, lambda g: (0, 0)),
            pl.BlockSpec(p["w2"].shape, lambda g: (0, 0)),
            pl.BlockSpec(p["t2"].shape, lambda g: (0, 0)),
            pl.BlockSpec(p["w3"].shape, lambda g: (0, 0)),
            pl.BlockSpec(p["t3"].shape, lambda g: (0, 0)),
            pl.BlockSpec(masks.shape, lambda g: (0, 0, 0)),
        ],
        out_specs=pl.BlockSpec((1, Cout, Ms), lambda g: (g, 0, 0)),
        compiler_params=pltpu.CompilerParams(dimension_semantics=("parallel",)),
    )(xg, p["w1sc"], p["t1sc"], p["w2"], p["t2"], p["w3"], p["t3"], masks)

    # (G, Cout, ips*HW) -> (N, Cout, H, W)  (already NCHW; just un-group)
    return out.reshape(G, Cout, ips, HW).transpose(0, 2, 1, 3).reshape(N, Cout, H, W)


# --------------------------- host-side param prep -----------------------------

def make_params(w1_pt, w2_pt, w3_pt, wsc_pt, bn1, bn2, bn3, bnsc, cardinality,
                eps=1e-5, compute_dtype=jnp.float32):
    """Fold inference-mode BN into the conv weights / shifts (transposed layout)."""
    def fold(bn):
        g, b, m, v = bn
        s = g / jnp.sqrt(v + eps)
        return s, b - m * s

    Cg = w1_pt.shape[0]
    s1, t1 = fold(bn1)
    s2, t2 = fold(bn2)
    s3, t3 = fold(bn3)
    ssc, tsc = fold(bnsc)

    # conv1 and shortcut conv share the input -> concatenate along output channels.
    w1 = w1_pt[:, :, 0, 0] * s1[:, None]                 # (Cg, Cin)
    wsc = wsc_pt[:, :, 0, 0] * ssc[:, None]              # (Cout, Cin)
    w1sc = jnp.concatenate([w1, wsc], axis=0)            # (Cg+Cout, Cin)
    t1sc = jnp.concatenate([t1, tsc])[:, None]           # (Cg+Cout, 1)

    # Grouped 3x3 weight -> dense block-diagonal (fine at toy cardinality; see TODO).
    pg = Cg // cardinality
    dense = jnp.zeros((Cg, Cg, 3, 3), jnp.float32)       # (O, I, kh, kw)
    for gi in range(cardinality):
        dense = dense.at[gi * pg:(gi + 1) * pg, gi * pg:(gi + 1) * pg].set(
            w2_pt[gi * pg:(gi + 1) * pg])
    # column index = (kh*3 + kw)*Cg + i  -> matches the tap-major slab in the kernel
    w2 = dense.transpose(0, 2, 3, 1).reshape(Cg, 9 * Cg) * s2[:, None]

    w3 = w3_pt[:, :, 0, 0] * s3[:, None]                 # (Cout, Cg)

    cd = compute_dtype
    return dict(w1sc=w1sc.astype(cd), t1sc=t1sc,
                w2=w2.astype(cd), t2=t2[:, None],
                w3=w3.astype(cd), t3=t3[:, None])


# --------------------------- reference (pure JAX) ------------------------------

def _bn_ref(y, g, b, m, v, eps=1e-5):
    g, b, m, v = (a[None, :, None, None] for a in (g, b, m, v))
    return (y - m) / jnp.sqrt(v + eps) * g + b


def ref_forward(x, pt):
    dn = ("NCHW", "OIHW", "NCHW")
    o = lax.conv_general_dilated(x, pt["w1"], (1, 1), "VALID", dimension_numbers=dn)
    o = jax.nn.relu(_bn_ref(o, *pt["bn1"]))
    o = lax.conv_general_dilated(o, pt["w2"], (1, 1), ((1, 1), (1, 1)),
                                 dimension_numbers=dn,
                                 feature_group_count=pt["card"])
    o = jax.nn.relu(_bn_ref(o, *pt["bn2"]))
    o = lax.conv_general_dilated(o, pt["w3"], (1, 1), "VALID", dimension_numbers=dn)
    o = _bn_ref(o, *pt["bn3"])
    sc = lax.conv_general_dilated(x, pt["wsc"], (1, 1), "VALID", dimension_numbers=dn)
    sc = _bn_ref(sc, *pt["bnsc"])
    return jax.nn.relu(o + sc)


# ---------------------------------- main ---------------------------------------

if __name__ == "__main__":
    key = jax.random.PRNGKey(0)
    N, Cin, H, W = 2, 8, 8, 8
    cardinality, bottleneck_width = 4, 4
    Cg = cardinality * bottleneck_width      # group_width = 16
    Cout = 2 * Cg                            # expansion * group_width = 32

    ks = jax.random.split(key, 9)
    w1_pt = 0.1 * jax.random.normal(ks[0], (Cg, Cin, 1, 1), jnp.float32)
    w2_pt = 0.1 * jax.random.normal(ks[1], (Cg, Cg // cardinality, 3, 3), jnp.float32)
    w3_pt = 0.1 * jax.random.normal(ks[2], (Cout, Cg, 1, 1), jnp.float32)
    wsc_pt = 0.1 * jax.random.normal(ks[3], (Cout, Cin, 1, 1), jnp.float32)

    def bn_params(k, c):
        k1, k2, k3, k4 = jax.random.split(k, 4)
        g = 1.0 + 0.1 * jax.random.normal(k1, (c,), jnp.float32)
        b = 0.1 * jax.random.normal(k2, (c,), jnp.float32)
        m = 0.1 * jax.random.normal(k3, (c,), jnp.float32)
        v = jax.random.uniform(k4, (c,), jnp.float32, 0.5, 1.5)
        return g, b, m, v

    bn1 = bn_params(ks[4], Cg)
    bn2 = bn_params(ks[5], Cg)
    bn3 = bn_params(ks[6], Cout)
    bnsc = bn_params(ks[7], Cout)

    x = jax.random.normal(ks[8], (N, Cin, H, W), jnp.float32)

    ref = ref_forward(x, dict(w1=w1_pt, w2=w2_pt, w3=w3_pt, wsc=wsc_pt,
                              bn1=bn1, bn2=bn2, bn3=bn3, bnsc=bnsc,
                              card=cardinality))

    # f32 matmul operands (v5e-safe path): tight tolerance vs the f32 reference.
    p32 = make_params(w1_pt, w2_pt, w3_pt, wsc_pt, bn1, bn2, bn3, bnsc,
                      cardinality, compute_dtype=jnp.float32)
    out32 = jax.block_until_ready(jax.jit(block_resnext_forward)(x, p32))
    np.testing.assert_allclose(np.asarray(out32), np.asarray(ref),
                               rtol=1e-4, atol=1e-4)

    # bf16 MXU operands (v6e/v7x fast path), f32 accumulation + f32 epilogue.
    pbf = make_params(w1_pt, w2_pt, w3_pt, wsc_pt, bn1, bn2, bn3, bnsc,
                      cardinality, compute_dtype=jnp.bfloat16)
    outbf = jax.block_until_ready(jax.jit(block_resnext_forward)(x, pbf))
    np.testing.assert_allclose(np.asarray(outbf), np.asarray(ref),
                               rtol=2e-2, atol=2e-2)

    assert out32.shape == (N, Cout, H, W)
    print("KERNEL_OK")
</pallas_src>

<mosaic_0001>
module attributes {stable_mosaic.version = 11 : i64} {
  func.func @_block_resnext_kernel(%arg0: i32, %arg1: memref<1x8x128xf32, #tpu.memory_space<vmem>>, %arg2: memref<48x8xf32, #tpu.memory_space<vmem>>, %arg3: memref<48x1xf32, #tpu.memory_space<vmem>>, %arg4: memref<16x144xf32, #tpu.memory_space<vmem>>, %arg5: memref<16x1xf32, #tpu.memory_space<vmem>>, %arg6: memref<32x16xf32, #tpu.memory_space<vmem>>, %arg7: memref<32x1xf32, #tpu.memory_space<vmem>>, %arg8: memref<9x1x128xf32, #tpu.memory_space<vmem>>, %arg9: memref<1x32x128xf32, #tpu.memory_space<vmem>>) attributes {dimension_semantics = [#tpu.dimension_semantics<parallel>], iteration_bounds = array<i64: 1>, scalar_prefetch = 0 : i64, scratch_operands = 0 : i64, tpu.core_type = #tpu.core_type<tc>, window_params = [{transform_indices = @transform_0, window_bounds = array<i64: 1, 8, 128>}, {pipeline_mode = #tpu.pipeline_mode<synchronous>, transform_indices = @transform_1, window_bounds = array<i64: 48, 8>}, {pipeline_mode = #tpu.pipeline_mode<synchronous>, transform_indices = @transform_2, window_bounds = array<i64: 48, 1>}, {pipeline_mode = #tpu.pipeline_mode<synchronous>, transform_indices = @transform_3, window_bounds = array<i64: 16, 144>}, {pipeline_mode = #tpu.pipeline_mode<synchronous>, transform_indices = @transform_4, window_bounds = array<i64: 16, 1>}, {pipeline_mode = #tpu.pipeline_mode<synchronous>, transform_indices = @transform_5, window_bounds = array<i64: 32, 16>}, {pipeline_mode = #tpu.pipeline_mode<synchronous>, transform_indices = @transform_6, window_bounds = array<i64: 32, 1>}, {pipeline_mode = #tpu.pipeline_mode<synchronous>, transform_indices = @transform_7, window_bounds = array<i64: 9, 1, 128>}, {transform_indices = @transform_8, window_bounds = array<i64: 1, 32, 128>}]} {
    %c0 = arith.constant 0 : index
    %c0_0 = arith.constant 0 : index
    %c0_1 = arith.constant 0 : index
    %0 = vector.load %arg1[%c0, %c0_0, %c0_1] : memref<1x8x128xf32, #tpu.memory_space<vmem>>, vector<1x8x128xf32>
    %1 = vector.shape_cast %0 : vector<1x8x128xf32> to vector<8x128xf32>
    %c0_2 = arith.constant 0 : index
    %c0_3 = arith.constant 0 : index
    %2 = vector.load %arg2[%c0_2, %c0_3] : memref<48x8xf32, #tpu.memory_space<vmem>>, vector<48x8xf32>
    %cst = arith.constant dense<0.000000e+00> : vector<48x128xf32>
    %3 = tpu.matmul %2, %1, %cst {dimension_numbers = #tpu.dot_dimension_numbers<[1], [0], [0], [1], [0, 0, 1, 1], [], []>} : vector<48x8xf32>, vector<8x128xf32>, vector<48x128xf32> -> vector<48x128xf32>
    %c0_4 = arith.constant 0 : index
    %c0_5 = arith.constant 0 : index
    %4 = vector.load %arg3[%c0_4, %c0_5] : memref<48x1xf32, #tpu.memory_space<vmem>>, vector<48x1xf32>
    %5 = vector.broadcast %4 : vector<48x1xf32> to vector<48x128xf32>
    %6 = arith.addf %3, %5 : vector<48x128xf32>
    %7 = vector.extract_strided_slice %6 {offsets = [0, 0], sizes = [16, 128], strides = [1, 1]} : vector<48x128xf32> to vector<16x128xf32>
    %cst_6 = arith.constant 0.000000e+00 : f32
    %8 = vector.broadcast %cst_6 : f32 to vector<16x128xf32>
    %9 = arith.maximumf %7, %8 : vector<16x128xf32>
    %10 = vector.extract_strided_slice %6 {offsets = [16, 0], sizes = [32, 128], strides = [1, 1]} : vector<48x128xf32> to vector<32x128xf32>
    %c9_i32 = arith.constant 9 : i32
    %11 = tpu.dynamic_rotate %9 by %c9_i32 dim 1 : vector<16x128xf32>, i32 -> vector<16x128xf32>
    %c0_7 = arith.constant 0 : index
    %c0_8 = arith.constant 0 : index
    %c0_9 = arith.constant 0 : index
    %12 = vector.load %arg8[%c0_7, %c0_8, %c0_9] : memref<9x1x128xf32, #tpu.memory_space<vmem>>, vector<1x1x128xf32>
    %13 = vector.shape_cast %12 : vector<1x1x128xf32> to vector<1x128xf32>
    %14 = vector.broadcast %13 : vector<1x128xf32> to vector<16x128xf32>
    %15 = arith.mulf %11, %14 : vector<16x128xf32>
    %c8_i32 = arith.constant 8 : i32
    %16 = tpu.dynamic_rotate %9 by %c8_i32 dim 1 : vector<16x128xf32>, i32 -> vector<16x128xf32>
    %c1 = arith.constant 1 : index
    %c0_10 = arith.constant 0 : index
    %c0_11 = arith.constant 0 : index
    %17 = vector.load %arg8[%c1, %c0_10, %c0_11] : memref<9x1x128xf32, #tpu.memory_space<vmem>>, vector<1x1x128xf32>
    %18 = vector.shape_cast %17 : vector<1x1x128xf32> to vector<1x128xf32>
    %19 = vector.broadcast %18 : vector<1x128xf32> to vector<16x128xf32>
    %20 = arith.mulf %16, %19 : vector<16x128xf32>
    %c7_i32 = arith.constant 7 : i32
    %21 = tpu.dynamic_rotate %9 by %c7_i32 dim 1 : vector<16x128xf32>, i32 -> vector<16x128xf32>
    %c2 = arith.constant 2 : index
    %c0_12 = arith.constant 0 : index
    %c0_13 = arith.constant 0 : index
    %22 = vector.load %arg8[%c2, %c0_12, %c0_13] : memref<9x1x128xf32, #tpu.memory_space<vmem>>, vector<1x1x128xf32>
    %23 = vector.shape_cast %22 : vector<1x1x128xf32> to vector<1x128xf32>
    %24 = vector.broadcast %23 : vector<1x128xf32> to vector<16x128xf32>
    %25 = arith.mulf %21, %24 : vector<16x128xf32>
    %c1_i32 = arith.constant 1 : i32
    %26 = tpu.dynamic_rotate %9 by %c1_i32 dim 1 : vector<16x128xf32>, i32 -> vector<16x128xf32>
    %c3 = arith.constant 3 : index
    %c0_14 = arith.constant 0 : index
    %c0_15 = arith.constant 0 : index
    %27 = vector.load %arg8[%c3, %c0_14, %c0_15] : memref<9x1x128xf32, #tpu.memory_space<vmem>>, vector<1x1x128xf32>
    %28 = vector.shape_cast %27 : vector<1x1x128xf32> to vector<1x128xf32>
    %29 = vector.broadcast %28 : vector<1x128xf32> to vector<16x128xf32>
    %30 = arith.mulf %26, %29 : vector<16x128xf32>
    %c4 = arith.constant 4 : index
    %c0_16 = arith.constant 0 : index
    %c0_17 = arith.constant 0 : index
    %31 = vector.load %arg8[%c4, %c0_16, %c0_17] : memref<9x1x128xf32, #tpu.memory_space<vmem>>, vector<1x1x128xf32>
    %32 = vector.shape_cast %31 : vector<1x1x128xf32> to vector<1x128xf32>
    %33 = vector.broadcast %32 : vector<1x128xf32> to vector<16x128xf32>
    %34 = arith.mulf %9, %33 : vector<16x128xf32>
    %c127_i32 = arith.constant 127 : i32
    %35 = tpu.dynamic_rotate %9 by %c127_i32 dim 1 : vector<16x128xf32>, i32 -> vector<16x128xf32>
    %c5 = arith.constant 5 : index
    %c0_18 = arith.constant 0 : index
    %c0_19 = arith.constant 0 : index
    %36 = vector.load %arg8[%c5, %c0_18, %c0_19] : memref<9x1x128xf32, #tpu.memory_space<vmem>>, vector<1x1x128xf32>
    %37 = vector.shape_cast %36 : vector<1x1x128xf32> to vector<1x128xf32>
    %38 = vector.broadcast %37 : vector<1x128xf32> to vector<16x128xf32>
    %39 = arith.mulf %35, %38 : vector<16x128xf32>
    %c121_i32 = arith.constant 121 : i32
    %40 = tpu.dynamic_rotate %9 by %c121_i32 dim 1 : vector<16x128xf32>, i32 -> vector<16x128xf32>
    %c6 = arith.constant 6 : index
    %c0_20 = arith.constant 0 : index
    %c0_21 = arith.constant 0 : index
    %41 = vector.load %arg8[%c6, %c0_20, %c0_21] : memref<9x1x128xf32, #tpu.memory_space<vmem>>, vector<1x1x128xf32>
    %42 = vector.shape_cast %41 : vector<1x1x128xf32> to vector<1x128xf32>
    %43 = vector.broadcast %42 : vector<1x128xf32> to vector<16x128xf32>
    %44 = arith.mulf %40, %43 : vector<16x128xf32>
    %c120_i32 = arith.constant 120 : i32
    %45 = tpu.dynamic_rotate %9 by %c120_i32 dim 1 : vector<16x128xf32>, i32 -> vector<16x128xf32>
    %c7 = arith.constant 7 : index
    %c0_22 = arith.constant 0 : index
    %c0_23 = arith.constant 0 : index
    %46 = vector.load %arg8[%c7, %c0_22, %c0_23] : memref<9x1x128xf32, #tpu.memory_space<vmem>>, vector<1x1x128xf32>
    %47 = vector.shape_cast %46 : vector<1x1x128xf32> to vector<1x128xf32>
    %48 = vector.broadcast %47 : vector<1x128xf32> to vector<16x128xf32>
    %49 = arith.mulf %45, %48 : vector<16x128xf32>
    %c119_i32 = arith.constant 119 : i32
    %50 = tpu.dynamic_rotate %9 by %c119_i32 dim 1 : vector<16x128xf32>, i32 -> vector<16x128xf32>
    %c8 = arith.constant 8 : index
    %c0_24 = arith.constant 0 : index
    %c0_25 = arith.constant 0 : index
    %51 = vector.load %arg8[%c8, %c0_24, %c0_25] : memref<9x1x128xf32, #tpu.memory_space<vmem>>, vector<1x1x128xf32>
    %52 = vector.shape_cast %51 : vector<1x1x128xf32> to vector<1x128xf32>
    %53 = vector.broadcast %52 : vector<1x128xf32> to vector<16x128xf32>
    %54 = arith.mulf %50, %53 : vector<16x128xf32>
    %55 = tpu.concatenate %15, %20, %25, %30, %34, %39, %44, %49, %54 in 0 : vector<16x128xf32>, vector<16x128xf32>, vector<16x128xf32>, vector<16x128xf32>, vector<16x128xf32>, vector<16x128xf32>, vector<16x128xf32>, vector<16x128xf32>, vector<16x128xf32> -> vector<144x128xf32>
    %c0_26 = arith.constant 0 : index
    %c0_27 = arith.constant 0 : index
    %56 = vector.load %arg4[%c0_26, %c0_27] : memref<16x144xf32, #tpu.memory_space<vmem>>, vector<16x144xf32>
    %cst_28 = arith.constant dense<0.000000e+00> : vector<16x128xf32>
    %57 = tpu.matmul %56, %55, %cst_28 {dimension_numbers = #tpu.dot_dimension_numbers<[1], [0], [0], [1], [0, 0, 1, 1], [], []>} : vector<16x144xf32>, vector<144x128xf32>, vector<16x128xf32> -> vector<16x128xf32>
    %c0_29 = arith.constant 0 : index
    %c0_30 = arith.constant 0 : index
    %58 = vector.load %arg5[%c0_29, %c0_30] : memref<16x1xf32, #tpu.memory_space<vmem>>, vector<16x1xf32>
    %59 = vector.broadcast %58 : vector<16x1xf32> to vector<16x128xf32>
    %60 = arith.addf %57, %59 : vector<16x128xf32>
    %cst_31 = arith.constant 0.000000e+00 : f32
    %61 = vector.broadcast %cst_31 : f32 to vector<16x128xf32>
    %62 = arith.maximumf %60, %61 : vector<16x128xf32>
    %c0_32 = arith.constant 0 : index
    %c0_33 = arith.constant 0 : index
    %63 = vector.load %arg6[%c0_32, %c0_33] : memref<32x16xf32, #tpu.memory_space<vmem>>, vector<32x16xf32>
    %cst_34 = arith.constant dense<0.000000e+00> : vector<32x128xf32>
    %64 = tpu.matmul %63, %62, %cst_34 {dimension_numbers = #tpu.dot_dimension_numbers<[1], [0], [0], [1], [0, 0, 1, 1], [], []>} : vector<32x16xf32>, vector<16x128xf32>, vector<32x128xf32> -> vector<32x128xf32>
    %c0_35 = arith.constant 0 : index
    %c0_36 = arith.constant 0 : index
    %65 = vector.load %arg7[%c0_35, %c0_36] : memref<32x1xf32, #tpu.memory_space<vmem>>, vector<32x1xf32>
    %66 = vector.broadcast %65 : vector<32x1xf32> to vector<32x128xf32>
    %67 = arith.addf %64, %66 : vector<32x128xf32>
    %68 = arith.addf %67, %10 : vector<32x128xf32>
    %cst_37 = arith.constant 0.000000e+00 : f32
    %69 = vector.broadcast %cst_37 : f32 to vector<32x128xf32>
    %70 = arith.maximumf %68, %69 : vector<32x128xf32>
    %c0_38 = arith.constant 0 : index
    %c0_39 = arith.constant 0 : index
    %c0_40 = arith.constant 0 : index
    %71 = vector.load %arg9[%c0_38, %c0_39, %c0_40] : memref<1x32x128xf32, #tpu.memory_space<vmem>>, vector<1x32x128xf32>
    %72 = vector.shape_cast %71 : vector<1x32x128xf32> to vector<32x128xf32>
    %73 = vector.shape_cast %70 : vector<32x128xf32> to vector<1x32x128xf32>
    tpu.vector_store %arg9[%c0_38, %c0_39, %c0_40], %73 {strides = array<i32>} : memref<1x32x128xf32, #tpu.memory_space<vmem>>, vector<1x32x128xf32>,
    return
  }
  func.func @transform_0(%arg0: i32) -> (i32, i32, i32) {
    %c0_i32 = arith.constant 0 : i32
    %c0_i32_0 = arith.constant 0 : i32
    %c0_i32_1 = arith.constant 0 : i32
    return %arg0, %c0_i32, %c0_i32_0 : i32, i32, i32
  }
  func.func @transform_1(%arg0: i32) -> (i32, i32) {
    %c0_i32 = arith.constant 0 : i32
    %c0_i32_0 = arith.constant 0 : i32
    %c0_i32_1 = arith.constant 0 : i32
    return %c0_i32, %c0_i32_0 : i32, i32
  }
  func.func @transform_2(%arg0: i32) -> (i32, i32) {
    %c0_i32 = arith.constant 0 : i32
    %c0_i32_0 = arith.constant 0 : i32
    %c0_i32_1 = arith.constant 0 : i32
    return %c0_i32, %c0_i32_0 : i32, i32
  }
  func.func @transform_3(%arg0: i32) -> (i32, i32) {
    %c0_i32 = arith.constant 0 : i32
    %c0_i32_0 = arith.constant 0 : i32
    %c0_i32_1 = arith.constant 0 : i32
    return %c0_i32, %c0_i32_0 : i32, i32
  }
  func.func @transform_4(%arg0: i32) -> (i32, i32) {
    %c0_i32 = arith.constant 0 : i32
    %c0_i32_0 = arith.constant 0 : i32
    %c0_i32_1 = arith.constant 0 : i32
    return %c0_i32, %c0_i32_0 : i32, i32
  }
  func.func @transform_5(%arg0: i32) -> (i32, i32) {
    %c0_i32 = arith.constant 0 : i32
    %c0_i32_0 = arith.constant 0 : i32
    %c0_i32_1 = arith.constant 0 : i32
    return %c0_i32, %c0_i32_0 : i32, i32
  }
  func.func @transform_6(%arg0: i32) -> (i32, i32) {
    %c0_i32 = arith.constant 0 : i32
    %c0_i32_0 = arith.constant 0 : i32
    %c0_i32_1 = arith.constant 0 : i32
    return %c0_i32, %c0_i32_0 : i32, i32
  }
  func.func @transform_7(%arg0: i32) -> (i32, i32, i32) {
    %c0_i32 = arith.constant 0 : i32
    %c0_i32_0 = arith.constant 0 : i32
    %c0_i32_1 = arith.constant 0 : i32
    %c0_i32_2 = arith.constant 0 : i32
    return %c0_i32, %c0_i32_0, %c0_i32_1 : i32, i32, i32
  }
  func.func @transform_8(%arg0: i32) -> (i32, i32, i32) {
    %c0_i32 = arith.constant 0 : i32
    %c0_i32_0 = arith.constant 0 : i32
    %c0_i32_1 = arith.constant 0 : i32
    return %arg0, %c0_i32, %c0_i32_0 : i32, i32, i32
  }
}

</mosaic_0001>

<bundles_post_ra>
// kernel: block_resnext_forward.1
= control target key start
LH: loop header
LB: loop body
LE: loop exit
PB: predicated region body
PF: predicated region fallthrough
CT: control target
= control target key end

     0   :  { %vm72_vm0 = vcmask 64512   ;;  %v420_v0 = vmov 0   ;;  %s421_s16 = smov 121   ;;  %s422_s17 = smov 120   ;;  %vm238_vm1 = vcmask 130048   ;;  %s617_s2 = inlined_call_operand.vmem [shape: f32[48,1], index: 2, kind: input, shape index: {}]   ;;  %s618_s0 = inlined_call_operand.vmem [shape: f32[1,8,128], index: 0, kind: input, shape index: {}]   ;;  %s619_s1 = inlined_call_operand.vmem [shape: f32[48,8], index: 1, kind: input, shape index: {}]   ;;  %s620_s7 = inlined_call_operand.vmem [shape: f32[9,1,128], index: 7, kind: input, shape index: {}]   ;;  %s621_s4 = inlined_call_operand.vmem [shape: f32[16,1], index: 4, kind: input, shape index: {}]   ;;  %s622_s6 = inlined_call_operand.vmem [shape: f32[32,1], index: 6, kind: input, shape index: {}]   ;;  %s623_s3 = inlined_call_operand.vmem [shape: f32[16,144], index: 3, kind: input, shape index: {}]   ;;  %s624_s5 = inlined_call_operand.vmem [shape: f32[32,16], index: 5, kind: input, shape index: {}]   ;;  %s625_s8 = inlined_call_operand.vmem [shape: f32[1,32,128], index: 8, kind: output, shape index: {}]  }
   0x1   :  { %408 = vset.pattern.permute.xlu0 %v420_v0  ;;  %v37_v1 = vld [vmem:[%s617_s2 + $0x8] sm:$0xff]  ;;  %v29_v2 = vld [vmem:[%s618_s0] sm:$0xff]  ;;  %409 = vset.pattern.permute.xlu1 %v420_v0  ;;  %v32_v7 = vld [vmem:[%s619_s1 + $0x10] sm:$0xff]  ;;  %s423_s20 = smov 127   ;;  %s424_s21 = smov 1  }
   0x2   :  { %v30_v3 = vld [vmem:[%s619_s1] sm:$0xff]  ;;  %49 = vperm.xlu0 %408, %v37_v1   ;;  %106 = vmatpush.msra.mxu0 %v29_v2  ;;  %v31_v5 = vld [vmem:[%s619_s1 + $0x8] sm:$0xff]  ;;  %v33_v12 = vld [vmem:[%s619_s1 + $0x18] sm:$0xff]  ;;  %s425_s22 = smov 7   ;;  %s426_s23 = smov 8  }
   0x3   :  { %378 = vmatmul.msk.f32.vlgmr.msra.gmra.mxu0 %vm72_vm0, %v30_v3  ;;  %398 = vmatpush.msra.mxu2 %v29_v2  ;;  %v36_v4 = vld [vmem:[%s617_s2] sm:$0xff]  ;;  %s427_s24 = smov 119   ;;  %v227_v16 = vld [vmem:[%s621_s4 + $0x8] sm:$0xff]  ;;  %s428_s27 = smov 9   ;;  %v39_v17 = vld [vmem:[%s617_s2 + $0x18] sm:$0xff] }
   0x4   :  { %410 = vset.pattern.permute.xlu2 %v420_v0  ;;  %v297_v18 = vld [vmem:[%s622_s6] sm:$0xff]  ;;  %v300_v19 = vld [vmem:[%s622_s6 + $0x18] sm:$0xff]  ;;  %v35_v23 = vld [vmem:[%s619_s1 + $0x28] sm:$0xff] }
   0x5   :  { %383 = vmatmul.msk.f32.vlgmr.msra.gmra.mxu2 %vm72_vm0, %v35_v23  ;;  %v414_v24 = vld [vmem:[%s620_s7 + $0x7] ss:$0 sm:$0xff]  ;;  %v411_v29 = vld [vmem:[%s620_s7 + $0x6] ss:$0 sm:$0xff]  ;;  %v415_v32 = vld [vmem:[%s620_s7 + $0x5] ss:$0 sm:$0xff] }
   0x6   :  { %v226_v36 = vld [vmem:[%s621_s4] sm:$0xff]  ;;  %v419_v52 = vld [vmem:[%s620_s7 + $0x8] ss:$0 sm:$0xff]  ;;  %v38_v56 = vld [vmem:[%s617_s2 + $0x10] sm:$0xff] }
   0x7   :  { %v418_v39 = vld [vmem:[%s620_s7 + $0x4] ss:$0 sm:$0xff]  ;;  %v413_v41 = vld [vmem:[%s620_s7 + $0x3] ss:$0 sm:$0xff]  ;;  %v412_v49 = vld [vmem:[%s620_s7 + $0x2] ss:$0 sm:$0xff] }
   0x8   :  { %v34_v45 = vld [vmem:[%s619_s1 + $0x20] sm:$0xff]  ;;  %v298_v57 = vld [vmem:[%s622_s6 + $0x8] sm:$0xff] }
   0x9   :  { %v40_v46 = vld [vmem:[%s617_s2 + $0x20] sm:$0xff]  ;;  %v223_v0 = vld [vmem:[%s623_s3 + $0x8] sm:$0xff] }
   0xa   :  { %44 = vperm.xlu0 %408, %v36_v4   ;;  %v416_v55 = vld [vmem:[%s620_s7 + $0x1] ss:$0 sm:$0xff]  ;;  %v41_v1 = vld [vmem:[%s617_s2 + $0x28] sm:$0xff]  ;;  %v417_v2 = vld [vmem:[%s620_s7] ss:$0 sm:$0xff] }
   0xb   :  { %379 = vmatmul.msk.f32.gmra.mxu0 %vm72_vm0, %v31_v5 }
  0x13   :  { %380 = vmatmul.msk.f32.gmra.mxu0 %vm72_vm0, %v32_v7  ;;  %v222_v7 = vld [vmem:[%s623_s3] sm:$0xff] }
  0x1b   :  { %381 = vmatmul.msk.f32.gmra.mxu0 %vm72_vm0, %v33_v12 }
  0x23   :  { %382 = vmatmul.msk.f32.gmra.mxu0 %vm72_vm0, %v34_v45 }
  0x74   :  { %v50_v6 = vpop.permute.xlu0 %49 }
  0x7c   :  { %v45_v8 = vpop.permute.xlu0 %44 }
  0x80   :  { %v108_v9 = vpop.f32.mrf.mxu0 }
  0x81   :  { %v109_v10 = vadd.f32 %v108_v9, %v45_v8  ;;  %v225_v8 = vld [vmem:[%s623_s3 + $0x18] sm:$0xff]  ;;  %v224_v9 = vld [vmem:[%s623_s3 + $0x10] sm:$0xff] }
  0x83   :  { %v495_v11 = vmax.f32 %v109_v10, 0.0 }
  0x85   :  { %189 = vrot.lane.b32.xlu2 %v495_v11, %s421_s16  ;;  %200 = vrot.lane.b32.xlu1 %v495_v11, %s422_s17  ;;  %v176_v44 = vmul.f32 %v418_v39, %v495_v11 }
  0x88   :  { %v111_v13 = vpop.f32.mrf.mxu0  ;;  %v123_v10 = vpop.f32.mrf.mxu2 }
  0x89   :  { %v112_v14 = vadd.f32 %v111_v13, %v50_v6 }
  0x8b   :  { %v127_v15 = vmax.f32 %v112_v14, 0.0 }
  0x8d   :  { %180 = vrot.lane.b32.xlu0 %v127_v15, %s423_s20  ;;  %191 = vrot.lane.b32.xlu2 %v127_v15, %s421_s16  ;;  %v177_v42 = vmul.f32 %v418_v39, %v127_v15 }
  0x8e   :  { %202 = vrot.lane.b32.xlu1 %v127_v15, %s422_s17 }
  0x95   :  { %160 = vrot.lane.b32.xlu0 %v495_v11, %s424_s21  ;;  %149 = vrot.lane.b32.xlu2 %v495_v11, %s425_s22 }
  0x96   :  { %178 = vrot.lane.b32.xlu1 %v495_v11, %s423_s20 }
  0x9d   :  { %140 = vrot.lane.b32.xlu0 %v127_v15, %s426_s23  ;;  %162 = vrot.lane.b32.xlu2 %v127_v15, %s424_s21 }
  0x9e   :  { %151 = vrot.lane.b32.xlu1 %v127_v15, %s425_s22 }
  0xa5   :  { %211 = vrot.lane.b32.xlu0 %v495_v11, %s427_s24  ;;  %138 = vrot.lane.b32.xlu2 %v495_v11, %s426_s23 }
  0xa6   :  { %213 = vrot.lane.b32.xlu1 %v127_v15, %s427_s24 }
  0xad   :  { %235 = vperm.xlu0 %408, %v227_v16   ;;  %128 = vrot.lane.b32.xlu2 %v495_v11, %s428_s27 }
  0xae   :  { %130 = vrot.lane.b32.xlu1 %v127_v15, %s428_s27 }
  0xb5   :  { %59 = vperm.xlu0 %408, %v39_v17   ;;  %54 = vperm.xlu2 %410, %v38_v56  }
  0xb6   :  { %230 = vperm.xlu1 %409, %v226_v36  }
  0xbd   :  { %303 = vperm.xlu0 %408, %v297_v18   ;;  %69 = vperm.xlu2 %410, %v41_v1  }
  0xbe   :  { %64 = vperm.xlu1 %409, %v40_v46  }
  0xc5   :  { %318 = vperm.xlu0 %408, %v300_v19   ;;  %v299_v19 = vld [vmem:[%s622_s6 + $0x10] sm:$0xff] }
  0xc6   :  { %308 = vperm.xlu1 %409, %v298_v57   ;;  %313 = vperm.xlu2 %410, %v299_v19  }
  0xdf   :  { %v190_v20 = vpop.permute.xlu2 %189 }
  0xe0   :  { %v198_v33 = vmul.f32 %v411_v29, %v190_v20 }
  0xe7   :  { %v192_v22 = vpop.permute.xlu2 %191 }
  0xe8   :  { %v199_v31 = vmul.f32 %v411_v29, %v192_v22  ;;  %v114_v29 = vpop.f32.mrf.mxu0 }
  0xef   :  { %v150_v28 = vpop.permute.xlu2 %149 }
  0xf0   :  { %v158_v54 = vmul.f32 %v412_v49, %v150_v28 }
  0xf7   :  { %v201_v21 = vpop.permute.xlu1 %200  ;;  %v163_v40 = vpop.permute.xlu2 %162 }
  0xf8   :  { %v209_v30 = vmul.f32 %v414_v24, %v201_v21  ;;  %v170_v48 = vmul.f32 %v413_v41, %v163_v40 }
  0xff   :  { %v181_v25 = vpop.permute.xlu0 %180  ;;  %v139_v53 = vpop.permute.xlu2 %138 }
 0x100   :  { %v203_v26 = vpop.permute.xlu1 %202  ;;  %v188_v37 = vmul.f32 %v415_v32, %v181_v25  ;;  %v147_v62 = vmul.f32 %v416_v55, %v139_v53  ;;  %v294_v25 = vld [vmem:[%s624_s5 + $0x8] sm:$0xff] }
 0x101   :  { %v210_v27 = vmul.f32 %v414_v24, %v203_v26  ;;  %v293_v24 = vld [vmem:[%s624_s5] sm:$0xff]  ;;  %v295_v26 = vld [vmem:[%s624_s5 + $0x10] sm:$0xff] }
 0x103   :  { %245 = vmatpush.msra.mxu1 %v210_v27  ;;  %v296_v27 = vld [vmem:[%s624_s5 + $0x18] sm:$0xff] }
 0x105   :  { %246 = vmatpush.msra.mxu1 %v209_v30 }
 0x107   :  { %247 = vmatpush.msra.mxu1 %v199_v31  ;;  %v161_v34 = vpop.permute.xlu0 %160  ;;  %v129_v3 = vpop.permute.xlu2 %128 }
 0x108   :  { %v179_v35 = vpop.permute.xlu1 %178  ;;  %v169_v50 = vmul.f32 %v413_v41, %v161_v34  ;;  %v136_v6 = vmul.f32 %v417_v2, %v129_v3 }
 0x109   :  { %248 = vmatpush.msra.mxu1 %v198_v33  ;;  %v187_v38 = vmul.f32 %v415_v32, %v179_v35 }
 0x10b   :  { %249 = vmatpush.msra.mxu1 %v188_v37 }
 0x10d   :  { %250 = vmatpush.msra.mxu1 %v187_v38  ;;  %v117_v38 = vpop.f32.mrf.mxu0 }
 0x10f   :  { %251 = vmatpush.msra.mxu1 %v177_v42  ;;  %v141_v43 = vpop.permute.xlu0 %140  ;;  %v55_v30 = vpop.permute.xlu2 %54 }
 0x110   :  { %v152_v47 = vpop.permute.xlu1 %151  ;;  %v148_v60 = vmul.f32 %v416_v55, %v141_v43  ;;  %v115_v32 = vadd.f32 %v114_v29, %v55_v30 }
 0x111   :  { %252 = vmatpush.msra.mxu1 %v176_v44  ;;  %v159_v51 = vmul.f32 %v412_v49, %v152_v47 }
 0x113   :  { %253 = vmatpush.msra.mxu1 %v170_v48 }
 0x115   :  { %254 = vmatpush.msra.mxu1 %v169_v50  ;;  %v120_v46 = vpop.f32.mrf.mxu0 }
 0x117   :  { %255 = vmatpush.msra.mxu1 %v159_v51  ;;  %v212_v58 = vpop.permute.xlu0 %211  ;;  %v70_v39 = vpop.permute.xlu2 %69 }
 0x118   :  { %v214_v59 = vpop.permute.xlu1 %213  ;;  %v220_v63 = vmul.f32 %v419_v52, %v212_v58  ;;  %v124_v55 = vadd.f32 %v123_v10, %v70_v39 }
 0x119   :  { %v221_v61 = vmul.f32 %v419_v52, %v214_v59  ;;  %256 = vmatpush.msra.mxu1 %v158_v54 }
 0x11b   :  { %257 = vmatpush.msra.mxu1 %v148_v60  ;;  %282 = vmatpush.msrb.mxu2 %v221_v61 }
 0x11d   :  { %258 = vmatpush.msra.mxu1 %v147_v62  ;;  %283 = vmatpush.msrb.mxu2 %v220_v63 }
 0x11e   :  { %392 = vmatmul.msk.f32.vlgmr.msrb.gmra.mxu2 %vm238_vm1, %v223_v0 }
 0x11f   :  { %v236_v14 = vpop.permute.xlu0 %235 }
 0x120   :  { %v131_v4 = vpop.permute.xlu1 %130  ;;  %v314_v47 = vpop.permute.xlu2 %313 }
 0x121   :  { %v137_v5 = vmul.f32 %v417_v2, %v131_v4 }
 0x123   :  { %259 = vmatpush.msra.mxu1 %v137_v5 }
 0x125   :  { %260 = vmatpush.msra.mxu1 %v136_v6 }
 0x126   :  { %261 = vmatmul.f32.vlgmr.msra.gmra.mxu1 %v222_v7  ;;  %393 = vmatmul.msk.f32.gmra.mxu2 %vm238_vm1, %v225_v8 }
 0x127   :  { %v60_v28 = vpop.permute.xlu0 %59 }
 0x128   :  { %v231_v13 = vpop.permute.xlu1 %230  ;;  %v118_v42 = vadd.f32 %v117_v38, %v60_v28 }
 0x12e   :  { %264 = vmatmul.f32.gmra.mxu1 %v224_v9 }
 0x12f   :  { %v304_v33 = vpop.permute.xlu0 %303 }
 0x130   :  { %v65_v31 = vpop.permute.xlu1 %64 }
 0x131   :  { %v121_v49 = vadd.f32 %v120_v46, %v65_v31 }
 0x137   :  { %v319_v53 = vpop.permute.xlu0 %318 }
 0x138   :  { %v309_v40 = vpop.permute.xlu1 %308 }
 0x1a1   :  { %v285_v11 = vpop.f32.mrf.mxu2 }
 0x1a3   :  { %v262_v12 = vpop.f32.mrf.mxu1 }
 0x1a4   :  { %v263_v15 = vadd.f32 %v262_v12, %v231_v13 }
 0x1a6   :  { %v286_v20 = vadd.f32 %v285_v11, %v263_v15 }
 0x1a8   :  { %v291_v23 = vmax.f32 %v286_v20, 0.0 }
 0x1a9   :  { %v288_v17 = vpop.f32.mrf.mxu2 }
 0x1ab   :  { %v265_v16 = vpop.f32.mrf.mxu1 }
 0x1ac   :  { %v266_v18 = vadd.f32 %v265_v16, %v236_v14 }
 0x1ae   :  { %v289_v21 = vadd.f32 %v288_v17, %v266_v18 }
 0x1b0   :  { %v292_v22 = vmax.f32 %v289_v21, 0.0 }
 0x1b2   :  { %347 = vmatpush.msra.mxu3 %v292_v22 }
 0x1b4   :  { %348 = vmatpush.msra.mxu3 %v291_v23 }
 0x1b5   :  { %394 = vmatmul.msk.f32.vlgmr.msra.gmra.mxu3 %vm238_vm1, %v293_v24 }
 0x1bd   :  { %395 = vmatmul.msk.f32.gmra.mxu3 %vm238_vm1, %v294_v25 }
 0x1c5   :  { %396 = vmatmul.msk.f32.gmra.mxu3 %vm238_vm1, %v295_v26 }
 0x1cd   :  { %397 = vmatmul.msk.f32.gmra.mxu3 %vm238_vm1, %v296_v27 }
 0x238   :  { %v350_v34 = vpop.f32.mrf.mxu3 }
 0x239   :  { %v351_v35 = vadd.f32 %v350_v34, %v304_v33 }
 0x23b   :  { %v362_v36 = vadd.f32 %v351_v35, %v115_v32 }
 0x23d   :  { %v366_v37 = vmax.f32 %v362_v36, 0.0 }
 0x23f   :  { %370 = vst [vmem:[%s625_s8] sm:$0xff] %v366_v37 }
 0x240   :  { %v353_v41 = vpop.f32.mrf.mxu3 }
 0x241   :  { %v354_v43 = vadd.f32 %v353_v41, %v309_v40 }
 0x243   :  { %v363_v44 = vadd.f32 %v354_v43, %v118_v42 }
 0x245   :  { %v367_v45 = vmax.f32 %v363_v44, 0.0 }
 0x247   :  { %371 = vst [vmem:[%s625_s8 + $0x8] sm:$0xff] %v367_v45 }
 0x248   :  { %v356_v48 = vpop.f32.mrf.mxu3 }
 0x249   :  { %v357_v50 = vadd.f32 %v356_v48, %v314_v47 }
 0x24b   :  { %v364_v51 = vadd.f32 %v357_v50, %v121_v49 }
 0x24d   :  { %v368_v52 = vmax.f32 %v364_v51, 0.0 }
 0x24f   :  { %372 = vst [vmem:[%s625_s8 + $0x10] sm:$0xff] %v368_v52 }
 0x250   :  { %v359_v54 = vpop.f32.mrf.mxu3 }
 0x251   :  { %v360_v56 = vadd.f32 %v359_v54, %v319_v53 }
 0x253   :  { %v365_v57 = vadd.f32 %v360_v56, %v124_v55 }
 0x255   :  { %v369_v58 = vmax.f32 %v365_v57, 0.0 }
 0x257   :  { %373 = vst [vmem:[%s625_s8 + $0x18] sm:$0xff] %v369_v58 }

</bundles_post_ra>
